<compile_context>
chip_gen: v7x
topology: tpu7x:2x2x1
jax: 0.10.0
libtpu: 0.0.40
codegen_flags: <defaults>
</compile_context>

<pallas_src>
import functools

import jax
import jax.numpy as jnp
from jax import lax
from jax.experimental import pallas as pl
from jax.experimental.pallas import tpu as pltpu


def _nt_xent_kernel(emb_i_ref, emb_j_ref, out_ref, acc_i_ref, acc_j_ref, *,
                    temperature, batch_size, seq_len, hidden, fold, row_block):
    s = pl.program_id(0)
    ns = pl.num_programs(0)

    @pl.when(s == 0)
    def _init():
        acc_i_ref[...] = jnp.zeros_like(acc_i_ref)
        acc_j_ref[...] = jnp.zeros_like(acc_j_ref)

    # Streaming phase: accumulate the (lane-densified) sequence sum for this
    # tile; inputs widened to f32 per tile only (bf16 inputs supported).
    acc_i_ref[...] += jnp.sum(emb_i_ref[...].astype(jnp.float32), axis=1)
    acc_j_ref[...] += jnp.sum(emb_j_ref[...].astype(jnp.float32), axis=1)

    @pl.when(s == ns - 1)
    def _finalize():
        B = batch_size
        D = hidden
        n2 = 2.0 * B
        inv_t = 1.0 / temperature

        # Fold the lane-densified partial sums: (B, fold*D) -> (B, D).
        def _fold(acc):
            m = acc[:, 0:D]
            for c in range(1, fold):
                m = m + acc[:, c * D:(c + 1) * D]
            return m

        m_i = _fold(acc_i_ref[...]) * (1.0 / seq_len)
        m_j = _fold(acc_j_ref[...]) * (1.0 / seq_len)

        # Row-wise L2 normalization (F.normalize eps = 1e-12).
        def _normalize(m):
            norm = jnp.sqrt(jnp.sum(m * m, axis=1, keepdims=True))
            return m / jnp.maximum(norm, 1e-12)

        z_i = _normalize(m_i)
        z_j = _normalize(m_j)

        # Positive pairs: sim[k, k+B] == sim[k+B, k] == <z_i_k, z_j_k>.
        pos_term = 2.0 * jnp.sum(z_i * z_j, keepdims=True) * inv_t   # (1, 1)

        reps = jnp.concatenate([z_i, z_j], axis=0)                   # (2B, D)
        reps_mm = reps.astype(jnp.bfloat16)                          # bf16 MXU path
        # Diagonal term from the same bf16 values so the off-diagonal
        # subtraction stays consistent with the MXU diagonal entries.
        reps_mm_f32 = reps_mm.astype(jnp.float32)
        diag_sq = jnp.sum(reps_mm_f32 * reps_mm_f32, axis=1, keepdims=True)
        e_diag = jnp.exp((diag_sq - 1.0) * inv_t)                    # (2B, 1)

        two_b = 2 * B
        log_denom = jnp.zeros((1, 1), jnp.float32)
        # Row-blocked similarity: each block is only (row_block, 2B); MXU
        # (dot), EUP (exp) and XLU (row-sum) work can overlap across blocks.
        for r0 in range(0, two_b, row_block):
            blk = reps_mm[r0:r0 + row_block, :]
            sim = lax.dot_general(blk, reps_mm, (((1,), (1,)), ((), ())),
                                  preferred_element_type=jnp.float32)
            e = jnp.exp((sim - 1.0) * inv_t)            # stable: sim <= ~1
            row = jnp.sum(e, axis=1, keepdims=True)     # (row_block, 1)
            denom_scaled = row - e_diag[r0:r0 + row_block, :]
            denom_scaled = jnp.maximum(denom_scaled, 1e-30)   # guard log(0)
            log_denom += jnp.sum(jnp.log(denom_scaled), keepdims=True)

        loss = (log_denom + n2 * inv_t - pos_term) * (1.0 / n2)
        out_ref[...] = loss.astype(out_ref.dtype)


def contrastive_loss_eli5(emb_i, emb_j, *, batch_size, temperature=0.5):
    B, S, D = emb_i.shape
    assert emb_j.shape == (B, S, D)
    assert B == batch_size

    # --- Lane-densify when D < 128: view (B, S, D) as (B, S/k, k*D).  This is
    # a layout-identical (free) reshape; partial sums are folded in finalize.
    fold = 1
    if D < 128:
        k_target = -(-128 // D)                      # ceil(128 / D)
        for k in range(min(k_target, S), 0, -1):
            if S % k == 0:
                fold = k
                break
    s_folded = S // fold
    d_eff = fold * D
    emb_i_r = emb_i.reshape(B, s_folded, d_eff)
    emb_j_r = emb_j.reshape(B, s_folded, d_eff)

    # --- Generation-aware VMEM limit (v7x: 64 MiB physical; v5e/v6e: 128 MiB).
    try:
        vmem_cap = int(pltpu.get_tpu_info().vmem_capacity_bytes)
    except Exception:
        vmem_cap = 64 * 1024 * 1024
    vmem_limit = max(32 << 20, min(int(vmem_cap * 0.75), 100 << 20))

    # --- Byte-budget tile picker (streaming phase is HBM-bandwidth bound):
    # target 2-4 MiB per input block; 2 inputs x 2 pipeline buffers + the two
    # resident f32 accumulators must stay under the scoped VMEM limit.
    itemsize = jnp.dtype(emb_i.dtype).itemsize
    acc_bytes = 2 * B * d_eff * 4
    # TODO(synk): for very large B*D the accumulator itself should be tiled
    # along D (extra grid axis + second pallas_call for the finalize).
    budget_for_blocks = max(vmem_limit - acc_bytes - (8 << 20), 2 << 20)
    per_block_target = min(budget_for_blocks // 4, 4 << 20)
    row_bytes = max(1, B * d_eff * itemsize)

    if s_folded * row_bytes <= per_block_target:
        seq_tile = s_folded                          # whole (folded) sequence
    else:
        max_tile = max(8, (per_block_target // row_bytes) // 8 * 8)
        seq_tile = s_folded
        best = None
        t = 8
        while t <= min(max_tile, s_folded):
            if s_folded % t == 0:
                best = t
            t += 8
        if best is not None:
            seq_tile = best
    num_tiles = s_folded // seq_tile

    # Row-block size for the finalize similarity (256 suits the 256x256 MXU).
    row_block = 2 * B
    if row_block > 256:
        for t in (256, 128, 64, 32, 16, 8):
            if row_block % t == 0:
                row_block = t
                break

    kernel = functools.partial(
        _nt_xent_kernel,
        temperature=float(temperature),
        batch_size=B,
        seq_len=float(S),
        hidden=D,
        fold=fold,
        row_block=row_block,
    )

    out = pl.pallas_call(
        kernel,
        out_shape=jax.ShapeDtypeStruct((1, 1), jnp.float32),
        grid=(num_tiles,),
        in_specs=[
            pl.BlockSpec((B, seq_tile, d_eff), lambda s: (0, s, 0)),
            pl.BlockSpec((B, seq_tile, d_eff), lambda s: (0, s, 0)),
        ],
        out_specs=pl.BlockSpec((1, 1), lambda s: (0, 0)),
        scratch_shapes=[
            pltpu.VMEM((B, d_eff), jnp.float32),   # sum over S of emb_i
            pltpu.VMEM((B, d_eff), jnp.float32),   # sum over S of emb_j
        ],
        compiler_params=pltpu.CompilerParams(
            dimension_semantics=("arbitrary",),    # S axis is a reduction
            vmem_limit_bytes=vmem_limit,
        ),
    )(emb_i_r, emb_j_r)
    return out[0, 0]


if __name__ == "__main__":
    # Small shapes consistent with the module's forward: (batch, seq, hidden).
    B, S, D = 2, 16, 32
    key = jax.random.PRNGKey(0)
    k1, k2 = jax.random.split(key)
    emb_i = jax.random.normal(k1, (B, S, D), dtype=jnp.float32)
    emb_j = jax.random.normal(k2, (B, S, D), dtype=jnp.float32)

    loss = contrastive_loss_eli5(emb_i, emb_j, batch_size=B, temperature=0.5)
    loss = jax.block_until_ready(loss)

    # Pure-JAX reference of the PyTorch forward (sanity check, loose tolerance
    # because the kernel uses bf16 MXU inputs for the similarity matmul).
    def _ref(ei, ej, t):
        zi = jnp.mean(ei, axis=1)
        zj = jnp.mean(ej, axis=1)
        zi = zi / jnp.maximum(jnp.linalg.norm(zi, axis=1, keepdims=True), 1e-12)
        zj = zj / jnp.maximum(jnp.linalg.norm(zj, axis=1, keepdims=True), 1e-12)
        reps = jnp.concatenate([zi, zj], axis=0)
        sim = reps @ reps.T
        n2 = reps.shape[0]
        e = jnp.exp(sim / t) * (1.0 - jnp.eye(n2))
        denom = jnp.sum(e, axis=1)
        pos = jnp.concatenate([jnp.sum(zi * zj, axis=1),
                               jnp.sum(zj * zi, axis=1)])
        return jnp.mean(-pos / t + jnp.log(denom))

    ref = jax.block_until_ready(_ref(emb_i, emb_j, 0.5))
    assert abs(float(loss) - float(ref)) < 5e-2, (float(loss), float(ref))
    print("KERNEL_OK")
</pallas_src>

<mosaic_0001>
module attributes {stable_mosaic.version = 11 : i64} {
  func.func @_nt_xent_kernel(%arg0: i32, %arg1: memref<2x4x128xf32, #tpu.memory_space<vmem>>, %arg2: memref<2x4x128xf32, #tpu.memory_space<vmem>>, %arg3: memref<1x1xf32, #tpu.memory_space<vmem>>, %arg4: memref<2x128xf32, #tpu.memory_space<vmem>>, %arg5: memref<2x128xf32, #tpu.memory_space<vmem>>) attributes {dimension_semantics = [#tpu.dimension_semantics<arbitrary>], iteration_bounds = array<i64: 1>, scalar_prefetch = 0 : i64, scratch_operands = 2 : i64, tpu.core_type = #tpu.core_type<tc>, window_params = [{transform_indices = @transform_0, window_bounds = array<i64: 2, 4, 128>}, {transform_indices = @transform_1, window_bounds = array<i64: 2, 4, 128>}, {pipeline_mode = #tpu.pipeline_mode<synchronous>, transform_indices = @transform_2, window_bounds = array<i64: 1, 1>}]} {
    %c0_i32 = arith.constant 0 : i32
    %0 = arith.cmpi eq, %arg0, %c0_i32 : i32
    %1 = arith.extui %0 : i1 to i32
    %c0_i32_0 = arith.constant 0 : i32
    %2 = arith.cmpi ne, %1, %c0_i32_0 : i32
    scf.if %2 {
      %cst_17 = arith.constant 0.000000e+00 : f32
      %16 = vector.broadcast %cst_17 : f32 to vector<2x128xf32>
      %c0_18 = arith.constant 0 : index
      %c0_19 = arith.constant 0 : index
      %17 = vector.load %arg4[%c0_18, %c0_19] : memref<2x128xf32, #tpu.memory_space<vmem>>, vector<2x128xf32>
      tpu.vector_store %arg4[%c0_18, %c0_19], %16 {strides = array<i32>} : memref<2x128xf32, #tpu.memory_space<vmem>>, vector<2x128xf32>,
      %cst_20 = arith.constant 0.000000e+00 : f32
      %18 = vector.broadcast %cst_20 : f32 to vector<2x128xf32>
      %c0_21 = arith.constant 0 : index
      %c0_22 = arith.constant 0 : index
      %19 = vector.load %arg5[%c0_21, %c0_22] : memref<2x128xf32, #tpu.memory_space<vmem>>, vector<2x128xf32>
      tpu.vector_store %arg5[%c0_21, %c0_22], %18 {strides = array<i32>} : memref<2x128xf32, #tpu.memory_space<vmem>>, vector<2x128xf32>,
    } else {
    }
    %c0 = arith.constant 0 : index
    %c0_1 = arith.constant 0 : index
    %3 = vector.load %arg4[%c0, %c0_1] : memref<2x128xf32, #tpu.memory_space<vmem>>, vector<2x128xf32>
    %c0_2 = arith.constant 0 : index
    %c0_3 = arith.constant 0 : index
    %c0_4 = arith.constant 0 : index
    %4 = vector.load %arg1[%c0_2, %c0_3, %c0_4] : memref<2x4x128xf32, #tpu.memory_space<vmem>>, vector<2x4x128xf32>
    %cst = arith.constant dense<0.000000e+00> : vector<2x128xf32>
    %5 = vector.multi_reduction <add>, %4, %cst [1] : vector<2x4x128xf32> to vector<2x128xf32>
    %6 = arith.addf %3, %5 : vector<2x128xf32>
    %c0_5 = arith.constant 0 : index
    %c0_6 = arith.constant 0 : index
    %7 = vector.load %arg4[%c0_5, %c0_6] : memref<2x128xf32, #tpu.memory_space<vmem>>, vector<2x128xf32>
    tpu.vector_store %arg4[%c0_5, %c0_6], %6 {strides = array<i32>} : memref<2x128xf32, #tpu.memory_space<vmem>>, vector<2x128xf32>,
    %c0_7 = arith.constant 0 : index
    %c0_8 = arith.constant 0 : index
    %8 = vector.load %arg5[%c0_7, %c0_8] : memref<2x128xf32, #tpu.memory_space<vmem>>, vector<2x128xf32>
    %c0_9 = arith.constant 0 : index
    %c0_10 = arith.constant 0 : index
    %c0_11 = arith.constant 0 : index
    %9 = vector.load %arg2[%c0_9, %c0_10, %c0_11] : memref<2x4x128xf32, #tpu.memory_space<vmem>>, vector<2x4x128xf32>
    %cst_12 = arith.constant dense<0.000000e+00> : vector<2x128xf32>
    %10 = vector.multi_reduction <add>, %9, %cst_12 [1] : vector<2x4x128xf32> to vector<2x128xf32>
    %11 = arith.addf %8, %10 : vector<2x128xf32>
    %c0_13 = arith.constant 0 : index
    %c0_14 = arith.constant 0 : index
    %12 = vector.load %arg5[%c0_13, %c0_14] : memref<2x128xf32, #tpu.memory_space<vmem>>, vector<2x128xf32>
    tpu.vector_store %arg5[%c0_13, %c0_14], %11 {strides = array<i32>} : memref<2x128xf32, #tpu.memory_space<vmem>>, vector<2x128xf32>,
    %c0_i32_15 = arith.constant 0 : i32
    %13 = arith.cmpi eq, %arg0, %c0_i32_15 : i32
    %14 = arith.extui %13 : i1 to i32
    %c0_i32_16 = arith.constant 0 : i32
    %15 = arith.cmpi ne, %14, %c0_i32_16 : i32
    scf.if %15 {
      %c0_17 = arith.constant 0 : index
      %c0_18 = arith.constant 0 : index
      %16 = vector.load %arg4[%c0_17, %c0_18] : memref<2x128xf32, #tpu.memory_space<vmem>>, vector<2x128xf32>
      %17 = vector.extract_strided_slice %16 {offsets = [0, 0], sizes = [2, 32], strides = [1, 1]} : vector<2x128xf32> to vector<2x32xf32>
      %18 = vector.extract_strided_slice %16 {offsets = [0, 32], sizes = [2, 32], strides = [1, 1]} : vector<2x128xf32> to vector<2x32xf32>
      %19 = arith.addf %17, %18 : vector<2x32xf32>
      %20 = vector.extract_strided_slice %16 {offsets = [0, 64], sizes = [2, 32], strides = [1, 1]} : vector<2x128xf32> to vector<2x32xf32>
      %21 = arith.addf %19, %20 : vector<2x32xf32>
      %22 = vector.extract_strided_slice %16 {offsets = [0, 96], sizes = [2, 32], strides = [1, 1]} : vector<2x128xf32> to vector<2x32xf32>
      %23 = arith.addf %21, %22 : vector<2x32xf32>
      %cst_19 = arith.constant 6.250000e-02 : f32
      %24 = vector.broadcast %cst_19 : f32 to vector<2x32xf32>
      %25 = arith.mulf %23, %24 : vector<2x32xf32>
      %c0_20 = arith.constant 0 : index
      %c0_21 = arith.constant 0 : index
      %26 = vector.load %arg5[%c0_20, %c0_21] : memref<2x128xf32, #tpu.memory_space<vmem>>, vector<2x128xf32>
      %27 = vector.extract_strided_slice %26 {offsets = [0, 0], sizes = [2, 32], strides = [1, 1]} : vector<2x128xf32> to vector<2x32xf32>
      %28 = vector.extract_strided_slice %26 {offsets = [0, 32], sizes = [2, 32], strides = [1, 1]} : vector<2x128xf32> to vector<2x32xf32>
      %29 = arith.addf %27, %28 : vector<2x32xf32>
      %30 = vector.extract_strided_slice %26 {offsets = [0, 64], sizes = [2, 32], strides = [1, 1]} : vector<2x128xf32> to vector<2x32xf32>
      %31 = arith.addf %29, %30 : vector<2x32xf32>
      %32 = vector.extract_strided_slice %26 {offsets = [0, 96], sizes = [2, 32], strides = [1, 1]} : vector<2x128xf32> to vector<2x32xf32>
      %33 = arith.addf %31, %32 : vector<2x32xf32>
      %cst_22 = arith.constant 6.250000e-02 : f32
      %34 = vector.broadcast %cst_22 : f32 to vector<2x32xf32>
      %35 = arith.mulf %33, %34 : vector<2x32xf32>
      %36 = arith.mulf %25, %25 : vector<2x32xf32>
      %cst_23 = arith.constant dense<0.000000e+00> : vector<2xf32>
      %37 = vector.multi_reduction <add>, %36, %cst_23 [1] : vector<2x32xf32> to vector<2xf32>
      %38 = vector.shape_cast %37 : vector<2xf32> to vector<2x1xf32>
      %39 = math.sqrt %38 : vector<2x1xf32>
      %cst_24 = arith.constant 9.99999996E-13 : f32
      %40 = vector.broadcast %cst_24 : f32 to vector<2x1xf32>
      %41 = arith.maximumf %39, %40 : vector<2x1xf32>
      %42 = vector.broadcast %41 : vector<2x1xf32> to vector<2x32xf32>
      %43 = arith.divf %25, %42 : vector<2x32xf32>
      %44 = arith.mulf %35, %35 : vector<2x32xf32>
      %cst_25 = arith.constant dense<0.000000e+00> : vector<2xf32>
      %45 = vector.multi_reduction <add>, %44, %cst_25 [1] : vector<2x32xf32> to vector<2xf32>
      %46 = vector.shape_cast %45 : vector<2xf32> to vector<2x1xf32>
      %47 = math.sqrt %46 : vector<2x1xf32>
      %cst_26 = arith.constant 9.99999996E-13 : f32
      %48 = vector.broadcast %cst_26 : f32 to vector<2x1xf32>
      %49 = arith.maximumf %47, %48 : vector<2x1xf32>
      %50 = vector.broadcast %49 : vector<2x1xf32> to vector<2x32xf32>
      %51 = arith.divf %35, %50 : vector<2x32xf32>
      %52 = arith.mulf %43, %51 : vector<2x32xf32>
      %53 = vector.shape_cast %52 : vector<2x32xf32> to vector<1x2x32xf32>
      %cst_27 = arith.constant dense<0.000000e+00> : vector<1xf32>
      %54 = vector.multi_reduction <add>, %53, %cst_27 [1, 2] : vector<1x2x32xf32> to vector<1xf32>
      %55 = vector.shape_cast %54 : vector<1xf32> to vector<1x1x1xf32>
      %56 = vector.extract %55[0, 0, 0] : f32 from vector<1x1x1xf32>
      %57 = vector.broadcast %56 : f32 to vector<1x1xf32>
      %cst_28 = arith.constant 2.000000e+00 : f32
      %58 = vector.broadcast %cst_28 : f32 to vector<1x1xf32>
      %59 = arith.mulf %58, %57 : vector<1x1xf32>
      %cst_29 = arith.constant 2.000000e+00 : f32
      %60 = vector.broadcast %cst_29 : f32 to vector<1x1xf32>
      %61 = arith.mulf %59, %60 : vector<1x1xf32>
      %62 = tpu.concatenate %43, %51 in 0 : vector<2x32xf32>, vector<2x32xf32> -> vector<4x32xf32>
      %63 = arith.truncf %62 : vector<4x32xf32> to vector<4x32xbf16>
      %64 = arith.extf %63 : vector<4x32xbf16> to vector<4x32xf32>
      %65 = arith.mulf %64, %64 : vector<4x32xf32>
      %cst_30 = arith.constant dense<0.000000e+00> : vector<4xf32>
      %66 = vector.multi_reduction <add>, %65, %cst_30 [1] : vector<4x32xf32> to vector<4xf32>
      %67 = vector.shape_cast %66 : vector<4xf32> to vector<4x1xf32>
      %cst_31 = arith.constant 1.000000e+00 : f32
      %68 = vector.broadcast %cst_31 : f32 to vector<4x1xf32>
      %69 = arith.subf %67, %68 : vector<4x1xf32>
      %cst_32 = arith.constant 2.000000e+00 : f32
      %70 = vector.broadcast %cst_32 : f32 to vector<4x1xf32>
      %71 = arith.mulf %69, %70 : vector<4x1xf32>
      %72 = math.exp %71 : vector<4x1xf32>
      %cst_33 = arith.constant 0.000000e+00 : f32
      %73 = vector.broadcast %cst_33 : f32 to vector<1x1xf32>
      %cst_34 = arith.constant dense<0.000000e+00> : vector<4x4xf32>
      %74 = tpu.matmul %63, %63, %cst_34 {dimension_numbers = #tpu.dot_dimension_numbers<[1], [1], [0], [0], [0, 0, 1, 0], [], []>} : vector<4x32xbf16>, vector<4x32xbf16>, vector<4x4xf32> -> vector<4x4xf32>
      %cst_35 = arith.constant 1.000000e+00 : f32
      %75 = vector.broadcast %cst_35 : f32 to vector<4x4xf32>
      %76 = arith.subf %74, %75 : vector<4x4xf32>
      %cst_36 = arith.constant 2.000000e+00 : f32
      %77 = vector.broadcast %cst_36 : f32 to vector<4x4xf32>
      %78 = arith.mulf %76, %77 : vector<4x4xf32>
      %79 = math.exp %78 : vector<4x4xf32>
      %cst_37 = arith.constant dense<0.000000e+00> : vector<4xf32>
      %80 = vector.multi_reduction <add>, %79, %cst_37 [1] : vector<4x4xf32> to vector<4xf32>
      %81 = vector.shape_cast %80 : vector<4xf32> to vector<4x1xf32>
      %82 = arith.subf %81, %72 : vector<4x1xf32>
      %cst_38 = arith.constant 1.000000e-30 : f32
      %83 = vector.broadcast %cst_38 : f32 to vector<4x1xf32>
      %84 = arith.maximumf %82, %83 : vector<4x1xf32>
      %85 = math.log %84 : vector<4x1xf32>
      %86 = vector.shape_cast %85 : vector<4x1xf32> to vector<1x4x1xf32>
      %cst_39 = arith.constant dense<0.000000e+00> : vector<1xf32>
      %87 = vector.multi_reduction <add>, %86, %cst_39 [1, 2] : vector<1x4x1xf32> to vector<1xf32>
      %88 = vector.shape_cast %87 : vector<1xf32> to vector<1x1x1xf32>
      %89 = vector.extract %88[0, 0, 0] : f32 from vector<1x1x1xf32>
      %90 = vector.broadcast %89 : f32 to vector<1x1xf32>
      %91 = arith.addf %73, %90 : vector<1x1xf32>
      %cst_40 = arith.constant 8.000000e+00 : f32
      %92 = vector.broadcast %cst_40 : f32 to vector<1x1xf32>
      %93 = arith.addf %91, %92 : vector<1x1xf32>
      %94 = arith.subf %93, %61 : vector<1x1xf32>
      %cst_41 = arith.constant 2.500000e-01 : f32
      %95 = vector.broadcast %cst_41 : f32 to vector<1x1xf32>
      %96 = arith.mulf %94, %95 : vector<1x1xf32>
      %c0_42 = arith.constant 0 : index
      %c0_43 = arith.constant 0 : index
      %97 = vector.load %arg3[%c0_42, %c0_43] : memref<1x1xf32, #tpu.memory_space<vmem>>, vector<1x1xf32>
      tpu.vector_store %arg3[%c0_42, %c0_43], %96 {strides = array<i32>} : memref<1x1xf32, #tpu.memory_space<vmem>>, vector<1x1xf32>,
    } else {
    }
    return
  }
  func.func @transform_0(%arg0: i32) -> (i32, i32, i32) {
    %c0_i32 = arith.constant 0 : i32
    %c0_i32_0 = arith.constant 0 : i32
    %c0_i32_1 = arith.constant 0 : i32
    return %c0_i32, %arg0, %c0_i32_0 : i32, i32, i32
  }
  func.func @transform_1(%arg0: i32) -> (i32, i32, i32) {
    %c0_i32 = arith.constant 0 : i32
    %c0_i32_0 = arith.constant 0 : i32
    %c0_i32_1 = arith.constant 0 : i32
    return %c0_i32, %arg0, %c0_i32_0 : i32, i32, i32
  }
  func.func @transform_2(%arg0: i32) -> (i32, i32) {
    %c0_i32 = arith.constant 0 : i32
    %c0_i32_0 = arith.constant 0 : i32
    %c0_i32_1 = arith.constant 0 : i32
    return %c0_i32, %c0_i32_0 : i32, i32
  }
}

</mosaic_0001>

<bundles_post_ra>
// kernel: tpu_custom_call.1
= control target key start
LH: loop header
LB: loop body
LE: loop exit
PB: predicated region body
PF: predicated region fallthrough
CT: control target
= control target key end

     0   :  { %7 = vsyncpa [#allocation5], 0  ;;  %s460_s0 = inlined_call_operand.hbm [shape: f32[2,4,128], index: 0, kind: input, shape index: {}]   ;;  %s461_s1 = inlined_call_operand.hbm [shape: f32[2,4,128], index: 1, kind: input, shape index: {}]   ;;  %s462_s2 = inlined_call_operand.hbm [shape: f32[1,1], index: 2, kind: output, shape index: {}]  }
   0x1   :  { %8 = vsyncpa [#allocation8], 0 }
   0x2   :  { %9 = vsyncpa [#allocation6], 0  ;;  %s387_s9 = smov [#allocation4]   ;;  %s315_s13 = scalar_lea.hbm %s460_s0, 128 }
   0x3   :  { %s15_s10 = sshll.u32 %s387_s9, 4  ;;  %p316_p0 = scmp.ne.s32.totalorder %s460_s0, %s315_s13  ;;  %s16_s10 = int_to_ptr.vmem [resolvable:$true] %s15_s10 }
   0x4   :  { %p319_p1 = scmp.lt.u32.totalorder %s315_s13, %s460_s0 }
   0x6   :  { %p321_p2 = pnand %p319_p1, %p316_p0 }
   0x8   :  { %324 = shalt.err (!%p321_p2)
}
   0x9   :  { %s325_s18 = scalar_lea.vmem %s16_s10, 128  ;;  %p330_p4 = scmp.lt.s32.totalorder %s16_s10, %s16_s10 }
   0xa   :  { %p326_p3 = scmp.ne.s32.totalorder %s16_s10, %s325_s18  ;;  %p331_p5 = scmp.lt.s32.totalorder %s325_s18, %s325_s18 }
   0xc   :  { %p332_p6 = por %p331_p5, %p330_p4 }
   0xe   :  { %p333_p7 = pnand %p332_p6, %p326_p3 }
  0x10   :  { %336 = shalt.err (!%p333_p7)
}
  0x11   :  { %s388_s19 = smov 64   ;;  %s389_s20 = smov 4  }
  0x12   :  { %21 = dma.hbm_to_vmem [thread:$0]  %s460_s0, 128, %s16_s10, [#allocation5], %s388_s19, %s388_s19, %s389_s20  }
  0x13   :  { %s390_s23 = smov [#allocation7]   ;;  %s337_s27 = scalar_lea.hbm %s461_s1, 128 }
  0x14   :  { %s27_s24 = sshll.u32 %s390_s23, 4  ;;  %p338_p8 = scmp.ne.s32.totalorder %s461_s1, %s337_s27  ;;  %s28_s24 = int_to_ptr.vmem [resolvable:$true] %s27_s24 }
  0x15   :  { %p341_p9 = scmp.lt.u32.totalorder %s337_s27, %s461_s1 }
  0x17   :  { %p343_p10 = pnand %p341_p9, %p338_p8 }
  0x19   :  { %346 = shalt.err (!%p343_p10)
}
  0x1a   :  { %s347_s4 = scalar_lea.vmem %s28_s24, 128  ;;  %p352_p12 = scmp.lt.s32.totalorder %s28_s24, %s28_s24 }
  0x1b   :  { %p348_p11 = scmp.ne.s32.totalorder %s28_s24, %s347_s4  ;;  %p353_p13 = scmp.lt.s32.totalorder %s347_s4, %s347_s4 }
  0x1d   :  { %p354_p0 = por %p353_p13, %p352_p12 }
  0x1f   :  { %p355_p1 = pnand %p354_p0, %p348_p11 }
  0x21   :  { %358 = shalt.err (!%p355_p1)
}
  0x22   :  { %33 = dma.hbm_to_vmem [thread:$0]  %s461_s1, 128, %s28_s24, [#allocation8], %s388_s19, %s388_s19, %s389_s20  }
  0x23   :  { %381 = dma.done.wait [#allocation5], 128  }
  0x24   :  { %382 = vsyncadd [#allocation5], 4294967168 }
  0x25   :  { %383 = dma.done.wait [#allocation8], 128  }
  0x26   :  { %384 = vsyncadd [#allocation8], 4294967168  ;;  %v391_v0 = vmov 0.0   ;;  %vm50_vm0 = vcmask 1043456   ;;  %v73_v1 = vld [vmem:[#allocation7] sm:$0xf] }
  0x27   :  { %46 = vst [vmem:[#allocation3] sm:$0x3] %v391_v0  ;;  %45 = vst [vmem:[#allocation2] sm:$0x3] %v391_v0  ;;  %282 = vmatprep.subr.bf16.mxu0 %v391_v0  ;;  %v74_v2 = vld [vmem:[#allocation7 + $0x4] sm:$0xf] }
  0x28   :  { %v48_v3 = vld [vmem:[#allocation4] sm:$0xf]  ;;  %v75_v4 = vsel %vm50_vm0, %v73_v1, 0.0  ;;  %v82_v5 = vsel %vm50_vm0, %v74_v2, 0.0  ;;  %v49_v8 = vld [vmem:[#allocation4 + $0x4] sm:$0xf] }
  0x29   :  { %v76_v6 = vrot.slane %v75_v4, 4  ;;  %v83_v7 = vrot.slane %v82_v5, 4  ;;  %v51_v9 = vsel %vm50_vm0, %v48_v3, 0.0  ;;  %v58_v11 = vsel %vm50_vm0, %v49_v8, 0.0  ;;  %s392_s1 = smov 96   ;;  %s393_s6 = smov 32  }
  0x2a   :  { %v52_v10 = vrot.slane %v51_v9, 4  ;;  %v59_v14 = vrot.slane %v58_v11, 4  ;;  %vm67_vm1 = vcmask 1041409   ;;  %vm129_vm2 = vcmask 254976   ;;  %s395_s9 = smov [#allocation9]  }
  0x2b   :  { %v77_v12 = vadd.f32 %v76_v6, %v75_v4  ;;  %v84_v13 = vadd.f32 %v83_v7, %v82_v5  ;;  %vm394_vm3 = vmmov 0   ;;  %vm174_vm8 = vcmask 1041408   ;;  %s267_s10 = sshll.u32 %s395_s9, 4  ;;  %s268_s10 = int_to_ptr.vmem [resolvable:$true] %s267_s10 }
  0x2c   :  { %v53_v15 = vadd.f32 %v52_v10, %v51_v9  ;;  %v60_v18 = vadd.f32 %v59_v14, %v58_v11  ;;  %284 = vmatprep.mubr.msk.bf16.mxu0 %vm394_vm3, %v391_v0  ;;  %vm187_vm9 = vcmask 261120   ;;  %vm179_vm10 = vcmask 257024   ;;  %s359_s11 = scalar_lea.vmem %s268_s10, 16  ;;  %s363_s12 = scalar_lea.vmem %s268_s10, 32 }
  0x2d   :  { %v78_v16 = vrot.slane %v77_v12, 2  ;;  %v85_v17 = vrot.slane %v84_v13, 2  ;;  %vm235_vm11 = vcmask 27648   ;;  %vm243_vm12 = vcmask 3072   ;;  %p360_p2 = scmp.ne.s32.totalorder %s268_s10, %s359_s11  ;;  %p364_p3 = scmp.lt.s32.totalorder %s268_s10, %s268_s10 }
  0x2e   :  { %v54_v19 = vrot.slane %v53_v15, 2  ;;  %v61_v22 = vrot.slane %v60_v18, 2  ;;  %v72_v28 = vld [vmem:[#allocation3] sm:$0x3]  ;;  %v47_v34 = vld [vmem:[#allocation2] sm:$0x3]  ;;  %p365_p4 = scmp.lt.s32.totalorder %s363_s12, %s359_s11 }
  0x2f   :  { %v79_v20 = vadd.f32 %v78_v16, %v77_v12  ;;  %v86_v21 = vadd.f32 %v85_v17, %v84_v13  ;;  %vm259_vm13 = vcmask 0  }
  0x30   :  { %v55_v23 = vadd.f32 %v54_v19, %v53_v15  ;;  %v62_v26 = vadd.f32 %v61_v22, %v60_v18  ;;  %p366_p5 = por %p365_p4, %p364_p3 }
  0x31   :  { %v80_v24 = vrot.slane %v79_v20, 1  ;;  %v87_v25 = vrot.slane %v86_v21, 1 }
  0x32   :  { %v56_v27 = vrot.slane %v55_v23, 1  ;;  %v63_v31 = vrot.slane %v62_v26, 1  ;;  %p367_p6 = pnand %p366_p5, %p360_p2 }
  0x33   :  { %v81_v29 = vadd.f32 %v80_v24, %v79_v20  ;;  %v88_v30 = vadd.f32 %v87_v25, %v86_v21 }
  0x34   :  { %v57_v32 = vadd.f32 %v56_v27, %v55_v23  ;;  %v64_v35 = vadd.f32 %v63_v31, %v62_v26 }
  0x35   :  { %v91_v33 = vsel %vm67_vm1, %v88_v30, %v81_v29 }
  0x36   :  { %v93_v36 = vadd.f32 %v91_v33, %v72_v28  ;;  %v68_v37 = vsel %vm67_vm1, %v64_v35, %v57_v32 }
  0x37   :  { %v70_v38 = vadd.f32 %v68_v37, %v47_v34 }
  0x38   :  { %94 = vst [vmem:[#allocation3] sm:$0x3] %v93_v36 }
  0x39   :  { %71 = vst [vmem:[#allocation2] sm:$0x3] %v70_v38 }
  0x3f   :  { %v113_v39 = vld [vmem:[#allocation3] sm:$0x3] }
  0x40   :  { %119 = vrot.lane.b32.xlu1 %v113_v39, %s388_s19  ;;  %115 = vrot.lane.b32.xlu0 %v113_v39, %s392_s1  ;;  %v98_v40 = vld [vmem:[#allocation2] sm:$0x3] }
  0x44   :  { %104 = vrot.lane.b32.xlu1 %v98_v40, %s388_s19  ;;  %100 = vrot.lane.b32.xlu0 %v98_v40, %s392_s1 }
  0x48   :  { %108 = vrot.lane.b32.xlu1 %v98_v40, %s393_s6  ;;  %123 = vrot.lane.b32.xlu0 %v113_v39, %s393_s6 }
  0xb2   :  { %v120_v41 = vpop.permute.xlu1 %119  ;;  %v116_v42 = vpop.permute.xlu0 %115 }
  0xb3   :  { %v118_v43 = vadd.f32 %v116_v42, %v113_v39 }
  0xb5   :  { %v122_v48 = vadd.f32 %v120_v41, %v118_v43 }
  0xb6   :  { %v105_v44 = vpop.permute.xlu1 %104  ;;  %v101_v45 = vpop.permute.xlu0 %100 }
  0xb7   :  { %v103_v46 = vadd.f32 %v101_v45, %v98_v40 }
  0xb9   :  { %v107_v47 = vadd.f32 %v105_v44, %v103_v46 }
  0xba   :  { %v109_v49 = vpop.permute.xlu1 %108  ;;  %v124_v50 = vpop.permute.xlu0 %123 }
  0xbb   :  { %v111_v51 = vadd.f32 %v109_v49, %v107_v47  ;;  %v126_v52 = vadd.f32 %v124_v50, %v122_v48 }
  0xbd   :  { %v112_v53 = vmul.f32 0.0625, %v111_v51  ;;  %v127_v54 = vmul.f32 0.0625, %v126_v52 }
  0xbf   :  { %v128_v55 = vmul.f32 %v112_v53, %v112_v53  ;;  %v143_v56 = vmul.f32 %v127_v54, %v127_v54 }
  0xc1   :  { %v130_v57 = vsel %vm129_vm2, %v128_v55, 0.0  ;;  %v144_v58 = vsel %vm129_vm2, %v143_v56, 0.0 }
  0xc2   :  { %131 = vadd.xlane.f32.xlu1 %v130_v57  ;;  %145 = vadd.xlane.f32.xlu0 %v144_v58 }
 0x14f   :  { %v132_v59 = vpop.xlane.xlu1 %131  ;;  %v146_v60 = vpop.xlane.xlu0 %145 }
 0x150   :  { %301 = vrsqrt.f32 %v132_v59  ;;  %vm135_vm4 = vcmp.eq.f32.partialorder %v132_v59, inf  ;;  %v138_v1 = vand.u32 2147483648, %v132_v59  ;;  %vm137_vm5 = vcmp.eq.f32.partialorder %v132_v59, 0.0 }
 0x151   :  { %303 = vrsqrt.f32 %v146_v60  ;;  %vm149_vm6 = vcmp.eq.f32.partialorder %v146_v60, inf  ;;  %v152_v4 = vand.u32 2147483648, %v146_v60  ;;  %vm151_vm7 = vcmp.eq.f32.partialorder %v146_v60, 0.0 }
 0x15a   :  { %v302_v61 = vpop.eup %301 }
 0x15b   :  { %v304_v62 = vpop.eup %303  ;;  %v134_v63 = vmul.f32 %v302_v61, %v132_v59 }
 0x15c   :  { %v148_v2 = vmul.f32 %v304_v62, %v146_v60 }
 0x15d   :  { %v136_v3 = vsel %vm135_vm4, %v132_v59, %v134_v63 }
 0x15e   :  { %v139_v5 = vsel %vm137_vm5, %v138_v1, %v136_v3  ;;  %v150_v6 = vsel %vm149_vm6, %v146_v60, %v148_v2 }
 0x15f   :  { %v140_v7 = vmax.f32 %v139_v5, 1e-12  ;;  %v153_v8 = vsel %vm151_vm7, %v152_v4, %v150_v6 }
 0x160   :  { %v154_v0 = vmax.f32 %v153_v8, 1e-12 }
 0x161   :  { %305 = vrcp.f32 %v140_v7 }
 0x162   :  { %307 = vrcp.f32 %v154_v0 }
 0x16b   :  { %v306_v9 = vpop.eup %305 }
 0x16c   :  { %v308_v10 = vpop.eup %307  ;;  %v142_v11 = vmul.f32 %v306_v9, %v112_v53 }
 0x16d   :  { %v156_v12 = vmul.f32 %v308_v10, %v127_v54 }
 0x16f   :  { %v157_v13 = vmul.f32 %v156_v12, %v142_v11  ;;  %v172_v14 = vrot.slane %v156_v12, 6 }
 0x171   :  { %v158_v15 = vsel %vm129_vm2, %v157_v13, 0.0  ;;  %v175_v16 = vsel %vm174_vm8, %v142_v11, %v172_v14 }
 0x172   :  { %159 = vadd.xlane.f32.xlu1 %v158_v15  ;;  %v176_v17 = vpack.c.bf16 %v175_v16, %v175_v16 }
 0x174   :  { %v189_v18 = vsel %vm187_vm9, %v176_v17, 0  ;;  %v177_v19 = vunpack.c.l.bf16 %v176_v17 }
 0x175   :  { %283 = vmatpush3.bf16.xpose.msra.mxu0 %v189_v18 }
 0x176   :  { %v178_v20 = vmul.f32 %v177_v19, %v177_v19 }
 0x178   :  { %v180_v21 = vsel %vm179_vm10, %v178_v20, 0.0 }
 0x179   :  { %181 = vadd.xlane.f32.xlu0 %v180_v21 }
 0x17c   :  { %285 = vmatmul.mubr.msk.bf16.vlgmr.msra.gmra.mrb[0].mxu0 %vm187_vm9, %v176_v17 }
 0x1ff   :  { %v160_v22 = vpop.xlane.xlu1 %159 }
 0x200   :  { %v161_v23 = vrot.slane %v160_v22, 4 }
 0x202   :  { %v162_v24 = vadd.f32 %v161_v23, %v160_v22 }
 0x204   :  { %v163_v25 = vrot.slane %v162_v24, 2 }
 0x206   :  { %v164_v26 = vadd.f32 %v163_v25, %v162_v24  ;;  %v182_v38 = vpop.xlane.xlu0 %181 }
 0x207   :  { %v277_v39 = vadd.f32 -1.0, %v182_v38 }
 0x208   :  { %v165_v27 = vrot.slane %v164_v26, 1 }
 0x209   :  { %v184_v40 = vmul.f32 2.0, %v277_v39 }
 0x20a   :  { %v166_v28 = vadd.f32 %v165_v27, %v164_v26 }
 0x20b   :  { %v185_v41 = vmul.f32 1.442695, %v184_v40 }
 0x20c   :  { %288 = vpush %v166_v28 }
 0x23d   :  { %s289_s7 = spop %288 }
 0x23e   :  { %v168_v56 = vstv %s289_s7 }
 0x23f   :  { %v169_v57 = vmul.f32 2.0, %v168_v56 }
 0x241   :  { %v170_v59 = vmul.f32 2.0, %v169_v57 }
 0x24f   :  { %v225_v29 = vpop.f32.mrb[0].mxu0 }
 0x250   :  { %v279_v30 = vadd.f32 -1.0, %v225_v29  ;;  %v286_v31 = vpop.f32.mrb[1].mxu0 }
 0x251   :  { %v228_v32 = vpop.f32.mrb[2].mxu0 }
 0x252   :  { %v232_v33 = vmul.f32 2.0, %v279_v30  ;;  %v287_v34 = vpop.f32.mrb[3].mxu0 }
 0x254   :  { %v233_v35 = vmul.f32 1.442695, %v232_v33 }
 0x256   :  { %309 = vpow2.f32 %v233_v35 }
 0x257   :  { %311 = vpow2.f32 %v185_v41 }
 0x260   :  { %v310_v36 = vpop.eup %309 }
 0x261   :  { %v236_v37 = vsel %vm235_vm11, %v310_v36, 0.0  ;;  %v312_v42 = vpop.eup %311 }
 0x262   :  { %237 = vadd.xlane.f32.xlu0 %v236_v37 }
 0x2ef   :  { %v238_v43 = vpop.xlane.xlu0 %237 }
 0x2f0   :  { %v239_v44 = vsub.f32 %v238_v43, %v312_v42 }
 0x2f2   :  { %v240_v45 = vmax.f32 %v239_v44, 1e-30 }
 0x2f4   :  { %313 = vlog2.f32 %v240_v45 }
 0x2fe   :  { %v314_v46 = vpop.eup %313 }
 0x2ff   :  { %v242_v47 = vmul.f32 0.6931472, %v314_v46 }
 0x301   :  { %v244_v48 = vsel %vm243_vm12, %v242_v47, 0.0 }
 0x302   :  { %245 = vadd.xlane.f32.xlu0 %v244_v48 }
 0x38f   :  { %v246_v49 = vpop.xlane.xlu0 %245 }
 0x390   :  { %v247_v50 = vrot.slane %v246_v49, 4 }
 0x392   :  { %v248_v51 = vadd.f32 %v247_v50, %v246_v49 }
 0x394   :  { %v249_v52 = vrot.slane %v248_v51, 2 }
 0x396   :  { %v250_v53 = vadd.f32 %v249_v52, %v248_v51 }
 0x398   :  { %v251_v54 = vrot.slane %v250_v53, 1 }
 0x39a   :  { %v252_v55 = vadd.f32 %v251_v54, %v250_v53 }
 0x39c   :  { %290 = vpush %v252_v55 }
 0x3cd   :  { %s291_s8 = spop %290 }
 0x3ce   :  { %v254_v58 = vstv %s291_s8 }
 0x3cf   :  { %v256_v60 = vadd.f32 8.0, %v254_v58 }
 0x3d1   :  { %v257_v61 = vsub.f32 %v256_v60, %v170_v59 }
 0x3d3   :  { %v258_v62 = vmul.f32 0.25, %v257_v61 }
 0x3d5   :  { %260 = vst.msk [vmem:[#allocation9] sm:$0x1] %vm259_vm13, %v258_v62 }
 0x3d6   :  { %370 = shalt.err (!%p367_p6)
}
 0x3d7   :  { %s371_s15 = scalar_lea.hbm %s462_s2, 16 }
 0x3d8   :  { %p372_p7 = scmp.ne.s32.totalorder %s462_s2, %s371_s15  ;;  %p375_p8 = scmp.lt.u32.totalorder %s371_s15, %s462_s2 }
 0x3da   :  { %p377_p9 = pnand %p375_p8, %p372_p7 }
 0x3dc   :  { %380 = shalt.err (!%p377_p9)
}
 0x3dd   :  { %270 = dma.vmem_to_hbm [thread:$0]  %s268_s10, 16, %s462_s2, [#allocation6]  }
 0x3de   :  { %385 = dma.done.wait [#allocation6], 16  }
 0x3df   :  { %386 = vsyncadd [#allocation6], 4294967280 }
 0x3e0   :  { %274 = vsyncpa [#allocation5], 1 }
 0x3e1   :  { %275 = vsyncpa [#allocation8], 1 }
 0x3e2   :  { %276 = vsyncpa [#allocation6], 1 }

</bundles_post_ra>
